<compile_context>
chip_gen: v5e
topology: v5e:2x2
jax: 0.10.0
libtpu: 0.0.40
codegen_flags: <defaults>
</compile_context>

<pallas_src>
import jax
import jax.numpy as jnp
from jax.experimental import pallas as pl
from jax.experimental.pallas import tpu as pltpu

EPS = 1e-5
NEG_SLOPE = 0.2


def _grouped_conv_bn_lrelu_kernel(x_ref, w_ref, gamma_ref, beta_ref, o_ref):
    """One grid step: gb patch-groups -> matmul (MXU) + BN(train) + LeakyReLU.

    x_ref:     (gb, BM, K)   bf16   im2col activations of gb groups
    w_ref:     (gb, nz, K)   bf16   conv weights, K-major (no transpose needed)
    gamma_ref: (1, gb*nz)    f32
    beta_ref:  (1, gb*nz)    f32
    o_ref:     (BM, gb*nz)   f32    lane-dense output slab
    """
    gb = x_ref.shape[0]

    # Per-group MXU matmul, contracting on K with the RHS kept (nz, K).
    # Static unroll over the gb groups of this block; results concatenated
    # into one lane-dense (BM, gb*nz) slab so BN/LeakyReLU/store are unmasked.
    ys = []
    for g in range(gb):
        ys.append(jax.lax.dot_general(
            x_ref[g], w_ref[g],
            dimension_numbers=(((1,), (1,)), ((), ())),
            preferred_element_type=jnp.float32))             # (BM, nz) f32
    y = ys[0] if gb == 1 else jnp.concatenate(ys, axis=-1)    # (BM, gb*nz)

    # BatchNorm2d training mode (biased variance over the BM rows of each
    # column), folded into a single per-channel scale/shift: z = y*a + b.
    mean = jnp.mean(y, axis=0, keepdims=True)                        # (1, gb*nz)
    var = jnp.mean(jnp.square(y - mean), axis=0, keepdims=True)      # (1, gb*nz)
    a = gamma_ref[...] * jax.lax.rsqrt(var + EPS)                    # rsqrt -> EUP
    b = beta_ref[...] - mean * a
    z = y * a + b

    # LeakyReLU(0.2) == max(z, 0.2*z)  (2 VPU ops instead of cmp/mul/select)
    o_ref[...] = jnp.maximum(z, NEG_SLOPE * z)


def _pick_group_block(G, nz, BM, K, in_bytes=2, budget_bytes=8 << 20):
    """Smallest divisor of G giving a lane-dense (multiple-of-128) output width
    within a small double-buffered VMEM budget.  Falls back to the whole group
    axis (block == full array dims is always a legal BlockSpec)."""
    def footprint(d):   # 2x for double buffering
        return 2 * (d * BM * K * in_bytes + d * nz * K * in_bytes
                    + BM * d * nz * 4 + 2 * d * nz * 4)
    for d in range(1, G):
        if G % d == 0 and (d * nz) % 128 == 0 and footprint(d) <= budget_bytes:
            return d
    return G


def encoder_layer_f(inp, conv_w, gamma, beta, *, nc, nz, h, w,
                    unfold_kernel, unfold_stride, conv_stride,
                    conv_padding, conv_kernel):
    """Pallas implementation of Encoder_Layer_F.forward (training-mode BN)."""
    B = inp.shape[0]
    uk, us, cs, cp, ck = (unfold_kernel, unfold_stride, conv_stride,
                          conv_padding, conv_kernel)
    assert h % us == 0 and w % us == 0
    assert h % cs == 0 and w % cs == 0
    assert uk % cs == 0 and us % cs == 0
    # The module's reshape after nn.Unfold only type-checks when the number of
    # unfold patches equals (h//us)*(w//us)  =>  uk <= us.
    assert uk <= us
    H, W = h // us, w // us
    G = H * W
    oq = uk // cs                      # conv output spatial size per patch
    sf = us // cs                      # fold stride
    assert (uk + 2 * cp - ck) // cs + 1 == oq, "conv geometry mismatch"
    M = oq * oq
    K = nc * ck * ck
    BM = B * M

    # ---- nn.Unfold: extract (nc, uk, uk) patches at stride us -> (B,G,nc,uk,uk)
    xp = inp.reshape(B, nc, H, us, W, us)[:, :, :, :uk, :, :uk]
    xp = xp.transpose(0, 2, 4, 1, 3, 5).reshape(B, G, nc, uk, uk)

    # ---- im2col for the per-group conv (K ordering = (c, kh, kw), matching
    #      PyTorch's (out, in, kh, kw) weight flatten).
    # TODO(synk): at production sizes, move this gather into the kernel
    # (pl.ANY + manual DMA / strided pl.ds reads) so the ~ck^2/cs^2-expanded
    # xcol is never materialized in HBM.
    xpad = jnp.pad(xp, ((0, 0), (0, 0), (0, 0), (cp, cp), (cp, cp)))
    cols = []
    for kh in range(ck):
        for kw in range(ck):
            cols.append(xpad[:, :, :,
                             kh:kh + cs * (oq - 1) + 1:cs,
                             kw:kw + cs * (oq - 1) + 1:cs])   # (B,G,nc,oq,oq)
    xcol = jnp.stack(cols, axis=3).reshape(B, G, K, M)
    xcol = xcol.transpose(1, 0, 3, 2).reshape(G, BM, K)       # (G, BM, K)

    # bf16 matmul inputs; f32 accumulation / BN / LeakyReLU inside the kernel.
    x_in = xcol.astype(jnp.bfloat16)
    w_in = conv_w.reshape(G, nz, K).astype(jnp.bfloat16)      # no HBM transpose
    g_in = gamma.reshape(1, G * nz).astype(jnp.float32)
    b_in = beta.reshape(1, G * nz).astype(jnp.float32)

    gb = _pick_group_block(G, nz, BM, K)
    n_blocks = G // gb

    yk = pl.pallas_call(
        _grouped_conv_bn_lrelu_kernel,
        out_shape=jax.ShapeDtypeStruct((BM, G * nz), jnp.float32),
        grid_spec=pltpu.PrefetchScalarGridSpec(
            num_scalar_prefetch=0,
            grid=(n_blocks,),
            in_specs=[
                pl.BlockSpec((gb, BM, K), lambda i: (i, 0, 0)),
                pl.BlockSpec((gb, nz, K), lambda i: (i, 0, 0)),
                pl.BlockSpec((1, gb * nz), lambda i: (0, i)),
                pl.BlockSpec((1, gb * nz), lambda i: (0, i)),
            ],
            out_specs=pl.BlockSpec((BM, gb * nz), lambda i: (0, i)),
        ),
        compiler_params=pltpu.CompilerParams(
            # "parallel": group blocks can shard across v7x's 2 TensorCores;
            # no-op on single-core v5e/v6e.
            dimension_semantics=("parallel",),
            # Within v6e/v7x scoped defaults and well under v7x's 64 MiB
            # physical VMEM; the per-step block is budgeted to <= 8 MiB
            # (double-buffered) in _pick_group_block.
            vmem_limit_bytes=32 * 1024 * 1024),
    )(x_in, w_in, g_in, b_in)                                 # (BM, G*nz) f32

    # ---- nn.Fold: place each group's (nz, oq, oq) tile at stride sf (no overlap)
    tiles = yk.reshape(B, oq, oq, H, W, nz)                   # (b,i,j,ph,pw,z)
    canvas = jnp.zeros((B, nz, H, sf, W, sf), jnp.float32)
    canvas = canvas.at[:, :, :, :oq, :, :oq].set(
        tiles.transpose(0, 5, 3, 1, 4, 2))                    # (b,z,ph,i,pw,j)
    return canvas.reshape(B, nz, H * sf, W * sf)              # (B,nz,hlat,wlat)


def reference_forward(inp, conv_w, gamma, beta, *, nc, nz, h, w,
                      unfold_kernel, unfold_stride, conv_stride,
                      conv_padding, conv_kernel):
    """Pure-JAX reference (lax grouped conv + training-mode BN + LeakyReLU + fold)."""
    B = inp.shape[0]
    uk, us, cs, cp, ck = (unfold_kernel, unfold_stride, conv_stride,
                          conv_padding, conv_kernel)
    H, W = h // us, w // us
    G = H * W
    oq = uk // cs
    sf = us // cs

    xp = inp.reshape(B, nc, H, us, W, us)[:, :, :, :uk, :, :uk]
    xp = xp.transpose(0, 2, 4, 1, 3, 5).reshape(B, G * nc, uk, uk)

    y = jax.lax.conv_general_dilated(
        xp, conv_w, window_strides=(cs, cs), padding=[(cp, cp), (cp, cp)],
        feature_group_count=G, dimension_numbers=('NCHW', 'OIHW', 'NCHW'),
        precision=jax.lax.Precision.HIGHEST)                  # (B, G*nz, oq, oq)

    mean = y.mean(axis=(0, 2, 3), keepdims=True)
    var = jnp.mean((y - mean) ** 2, axis=(0, 2, 3), keepdims=True)
    z = (y - mean) * jax.lax.rsqrt(var + EPS)
    z = z * gamma.reshape(1, -1, 1, 1) + beta.reshape(1, -1, 1, 1)
    z = jnp.where(z >= 0, z, NEG_SLOPE * z)

    zr = z.reshape(B, H, W, nz, oq, oq)
    canvas = jnp.zeros((B, nz, H, sf, W, sf), jnp.float32)
    canvas = canvas.at[:, :, :, :oq, :, :oq].set(zr.transpose(0, 3, 1, 4, 2, 5))
    return canvas.reshape(B, nz, H * sf, W * sf)


if __name__ == "__main__":
    # Small config that still exercises the lane-dense multi-step grid:
    # G = H*W = 32 patch groups, nz = 8 -> gb = 16 groups/step, 128-wide
    # output blocks, grid = (2,).
    B, nc, nz = 2, 4, 8
    h, w = 32, 64
    unfold_kernel = unfold_stride = 8          # non-overlapping patches
    conv_stride, conv_padding, conv_kernel = 2, 1, 4
    H, W = h // unfold_stride, w // unfold_stride
    G = H * W

    cfg = dict(nc=nc, nz=nz, h=h, w=w,
               unfold_kernel=unfold_kernel, unfold_stride=unfold_stride,
               conv_stride=conv_stride, conv_padding=conv_padding,
               conv_kernel=conv_kernel)

    key = jax.random.PRNGKey(0)
    k_x, k_w, k_g, k_b = jax.random.split(key, 4)
    x = jax.random.normal(k_x, (B, nc, h, w), dtype=jnp.float32)
    conv_w = 0.1 * jax.random.normal(
        k_w, (G * nz, nc, conv_kernel, conv_kernel), dtype=jnp.float32)
    gamma = 1.0 + 0.1 * jax.random.normal(k_g, (G * nz,), dtype=jnp.float32)
    beta = 0.1 * jax.random.normal(k_b, (G * nz,), dtype=jnp.float32)

    out = jax.block_until_ready(encoder_layer_f(x, conv_w, gamma, beta, **cfg))
    ref = jax.block_until_ready(
        reference_forward(x, conv_w, gamma, beta, **cfg))

    assert out.shape == (B, nz, h // conv_stride, w // conv_stride), out.shape
    # bf16 matmul inputs (f32 accumulation) vs. f32 HIGHEST-precision reference.
    assert jnp.allclose(out, ref, atol=2e-2, rtol=2e-2), float(
        jnp.max(jnp.abs(out - ref)))

    print("KERNEL_OK")
</pallas_src>

<mosaic_0001>
module attributes {stable_mosaic.version = 11 : i64} {
  func.func @_grouped_conv_bn_lrelu_kernel(%arg0: i32, %arg1: memref<16x32x64xbf16, #tpu.memory_space<vmem>>, %arg2: memref<16x8x64xbf16, #tpu.memory_space<vmem>>, %arg3: memref<1x128xf32, #tpu.memory_space<vmem>>, %arg4: memref<1x128xf32, #tpu.memory_space<vmem>>, %arg5: memref<32x128xf32, #tpu.memory_space<vmem>>) attributes {dimension_semantics = [#tpu.dimension_semantics<parallel>], iteration_bounds = array<i64: 2>, scalar_prefetch = 0 : i64, scratch_operands = 0 : i64, tpu.core_type = #tpu.core_type<tc>, window_params = [{transform_indices = @transform_0, window_bounds = array<i64: 16, 32, 64>}, {transform_indices = @transform_1, window_bounds = array<i64: 16, 8, 64>}, {transform_indices = @transform_2, window_bounds = array<i64: 1, 128>}, {transform_indices = @transform_3, window_bounds = array<i64: 1, 128>}, {transform_indices = @transform_4, window_bounds = array<i64: 32, 128>}]} {
    %c0 = arith.constant 0 : index
    %c0_0 = arith.constant 0 : index
    %c0_1 = arith.constant 0 : index
    %0 = vector.load %arg1[%c0, %c0_0, %c0_1] : memref<16x32x64xbf16, #tpu.memory_space<vmem>>, vector<1x32x64xbf16>
    %1 = vector.shape_cast %0 : vector<1x32x64xbf16> to vector<32x64xbf16>
    %c0_2 = arith.constant 0 : index
    %c0_3 = arith.constant 0 : index
    %c0_4 = arith.constant 0 : index
    %2 = vector.load %arg2[%c0_2, %c0_3, %c0_4] : memref<16x8x64xbf16, #tpu.memory_space<vmem>>, vector<1x8x64xbf16>
    %3 = vector.shape_cast %2 : vector<1x8x64xbf16> to vector<8x64xbf16>
    %cst = arith.constant dense<0.000000e+00> : vector<32x8xf32>
    %4 = tpu.matmul %1, %3, %cst {dimension_numbers = #tpu.dot_dimension_numbers<[1], [1], [0], [0], [0, 0, 1, 0], [], []>} : vector<32x64xbf16>, vector<8x64xbf16>, vector<32x8xf32> -> vector<32x8xf32>
    %c1 = arith.constant 1 : index
    %c0_5 = arith.constant 0 : index
    %c0_6 = arith.constant 0 : index
    %5 = vector.load %arg1[%c1, %c0_5, %c0_6] : memref<16x32x64xbf16, #tpu.memory_space<vmem>>, vector<1x32x64xbf16>
    %6 = vector.shape_cast %5 : vector<1x32x64xbf16> to vector<32x64xbf16>
    %c1_7 = arith.constant 1 : index
    %c0_8 = arith.constant 0 : index
    %c0_9 = arith.constant 0 : index
    %7 = vector.load %arg2[%c1_7, %c0_8, %c0_9] : memref<16x8x64xbf16, #tpu.memory_space<vmem>>, vector<1x8x64xbf16>
    %8 = vector.shape_cast %7 : vector<1x8x64xbf16> to vector<8x64xbf16>
    %cst_10 = arith.constant dense<0.000000e+00> : vector<32x8xf32>
    %9 = tpu.matmul %6, %8, %cst_10 {dimension_numbers = #tpu.dot_dimension_numbers<[1], [1], [0], [0], [0, 0, 1, 0], [], []>} : vector<32x64xbf16>, vector<8x64xbf16>, vector<32x8xf32> -> vector<32x8xf32>
    %c2 = arith.constant 2 : index
    %c0_11 = arith.constant 0 : index
    %c0_12 = arith.constant 0 : index
    %10 = vector.load %arg1[%c2, %c0_11, %c0_12] : memref<16x32x64xbf16, #tpu.memory_space<vmem>>, vector<1x32x64xbf16>
    %11 = vector.shape_cast %10 : vector<1x32x64xbf16> to vector<32x64xbf16>
    %c2_13 = arith.constant 2 : index
    %c0_14 = arith.constant 0 : index
    %c0_15 = arith.constant 0 : index
    %12 = vector.load %arg2[%c2_13, %c0_14, %c0_15] : memref<16x8x64xbf16, #tpu.memory_space<vmem>>, vector<1x8x64xbf16>
    %13 = vector.shape_cast %12 : vector<1x8x64xbf16> to vector<8x64xbf16>
    %cst_16 = arith.constant dense<0.000000e+00> : vector<32x8xf32>
    %14 = tpu.matmul %11, %13, %cst_16 {dimension_numbers = #tpu.dot_dimension_numbers<[1], [1], [0], [0], [0, 0, 1, 0], [], []>} : vector<32x64xbf16>, vector<8x64xbf16>, vector<32x8xf32> -> vector<32x8xf32>
    %c3 = arith.constant 3 : index
    %c0_17 = arith.constant 0 : index
    %c0_18 = arith.constant 0 : index
    %15 = vector.load %arg1[%c3, %c0_17, %c0_18] : memref<16x32x64xbf16, #tpu.memory_space<vmem>>, vector<1x32x64xbf16>
    %16 = vector.shape_cast %15 : vector<1x32x64xbf16> to vector<32x64xbf16>
    %c3_19 = arith.constant 3 : index
    %c0_20 = arith.constant 0 : index
    %c0_21 = arith.constant 0 : index
    %17 = vector.load %arg2[%c3_19, %c0_20, %c0_21] : memref<16x8x64xbf16, #tpu.memory_space<vmem>>, vector<1x8x64xbf16>
    %18 = vector.shape_cast %17 : vector<1x8x64xbf16> to vector<8x64xbf16>
    %cst_22 = arith.constant dense<0.000000e+00> : vector<32x8xf32>
    %19 = tpu.matmul %16, %18, %cst_22 {dimension_numbers = #tpu.dot_dimension_numbers<[1], [1], [0], [0], [0, 0, 1, 0], [], []>} : vector<32x64xbf16>, vector<8x64xbf16>, vector<32x8xf32> -> vector<32x8xf32>
    %c4 = arith.constant 4 : index
    %c0_23 = arith.constant 0 : index
    %c0_24 = arith.constant 0 : index
    %20 = vector.load %arg1[%c4, %c0_23, %c0_24] : memref<16x32x64xbf16, #tpu.memory_space<vmem>>, vector<1x32x64xbf16>
    %21 = vector.shape_cast %20 : vector<1x32x64xbf16> to vector<32x64xbf16>
    %c4_25 = arith.constant 4 : index
    %c0_26 = arith.constant 0 : index
    %c0_27 = arith.constant 0 : index
    %22 = vector.load %arg2[%c4_25, %c0_26, %c0_27] : memref<16x8x64xbf16, #tpu.memory_space<vmem>>, vector<1x8x64xbf16>
    %23 = vector.shape_cast %22 : vector<1x8x64xbf16> to vector<8x64xbf16>
    %cst_28 = arith.constant dense<0.000000e+00> : vector<32x8xf32>
    %24 = tpu.matmul %21, %23, %cst_28 {dimension_numbers = #tpu.dot_dimension_numbers<[1], [1], [0], [0], [0, 0, 1, 0], [], []>} : vector<32x64xbf16>, vector<8x64xbf16>, vector<32x8xf32> -> vector<32x8xf32>
    %c5 = arith.constant 5 : index
    %c0_29 = arith.constant 0 : index
    %c0_30 = arith.constant 0 : index
    %25 = vector.load %arg1[%c5, %c0_29, %c0_30] : memref<16x32x64xbf16, #tpu.memory_space<vmem>>, vector<1x32x64xbf16>
    %26 = vector.shape_cast %25 : vector<1x32x64xbf16> to vector<32x64xbf16>
    %c5_31 = arith.constant 5 : index
    %c0_32 = arith.constant 0 : index
    %c0_33 = arith.constant 0 : index
    %27 = vector.load %arg2[%c5_31, %c0_32, %c0_33] : memref<16x8x64xbf16, #tpu.memory_space<vmem>>, vector<1x8x64xbf16>
    %28 = vector.shape_cast %27 : vector<1x8x64xbf16> to vector<8x64xbf16>
    %cst_34 = arith.constant dense<0.000000e+00> : vector<32x8xf32>
    %29 = tpu.matmul %26, %28, %cst_34 {dimension_numbers = #tpu.dot_dimension_numbers<[1], [1], [0], [0], [0, 0, 1, 0], [], []>} : vector<32x64xbf16>, vector<8x64xbf16>, vector<32x8xf32> -> vector<32x8xf32>
    %c6 = arith.constant 6 : index
    %c0_35 = arith.constant 0 : index
    %c0_36 = arith.constant 0 : index
    %30 = vector.load %arg1[%c6, %c0_35, %c0_36] : memref<16x32x64xbf16, #tpu.memory_space<vmem>>, vector<1x32x64xbf16>
    %31 = vector.shape_cast %30 : vector<1x32x64xbf16> to vector<32x64xbf16>
    %c6_37 = arith.constant 6 : index
    %c0_38 = arith.constant 0 : index
    %c0_39 = arith.constant 0 : index
    %32 = vector.load %arg2[%c6_37, %c0_38, %c0_39] : memref<16x8x64xbf16, #tpu.memory_space<vmem>>, vector<1x8x64xbf16>
    %33 = vector.shape_cast %32 : vector<1x8x64xbf16> to vector<8x64xbf16>
    %cst_40 = arith.constant dense<0.000000e+00> : vector<32x8xf32>
    %34 = tpu.matmul %31, %33, %cst_40 {dimension_numbers = #tpu.dot_dimension_numbers<[1], [1], [0], [0], [0, 0, 1, 0], [], []>} : vector<32x64xbf16>, vector<8x64xbf16>, vector<32x8xf32> -> vector<32x8xf32>
    %c7 = arith.constant 7 : index
    %c0_41 = arith.constant 0 : index
    %c0_42 = arith.constant 0 : index
    %35 = vector.load %arg1[%c7, %c0_41, %c0_42] : memref<16x32x64xbf16, #tpu.memory_space<vmem>>, vector<1x32x64xbf16>
    %36 = vector.shape_cast %35 : vector<1x32x64xbf16> to vector<32x64xbf16>
    %c7_43 = arith.constant 7 : index
    %c0_44 = arith.constant 0 : index
    %c0_45 = arith.constant 0 : index
    %37 = vector.load %arg2[%c7_43, %c0_44, %c0_45] : memref<16x8x64xbf16, #tpu.memory_space<vmem>>, vector<1x8x64xbf16>
    %38 = vector.shape_cast %37 : vector<1x8x64xbf16> to vector<8x64xbf16>
    %cst_46 = arith.constant dense<0.000000e+00> : vector<32x8xf32>
    %39 = tpu.matmul %36, %38, %cst_46 {dimension_numbers = #tpu.dot_dimension_numbers<[1], [1], [0], [0], [0, 0, 1, 0], [], []>} : vector<32x64xbf16>, vector<8x64xbf16>, vector<32x8xf32> -> vector<32x8xf32>
    %c8 = arith.constant 8 : index
    %c0_47 = arith.constant 0 : index
    %c0_48 = arith.constant 0 : index
    %40 = vector.load %arg1[%c8, %c0_47, %c0_48] : memref<16x32x64xbf16, #tpu.memory_space<vmem>>, vector<1x32x64xbf16>
    %41 = vector.shape_cast %40 : vector<1x32x64xbf16> to vector<32x64xbf16>
    %c8_49 = arith.constant 8 : index
    %c0_50 = arith.constant 0 : index
    %c0_51 = arith.constant 0 : index
    %42 = vector.load %arg2[%c8_49, %c0_50, %c0_51] : memref<16x8x64xbf16, #tpu.memory_space<vmem>>, vector<1x8x64xbf16>
    %43 = vector.shape_cast %42 : vector<1x8x64xbf16> to vector<8x64xbf16>
    %cst_52 = arith.constant dense<0.000000e+00> : vector<32x8xf32>
    %44 = tpu.matmul %41, %43, %cst_52 {dimension_numbers = #tpu.dot_dimension_numbers<[1], [1], [0], [0], [0, 0, 1, 0], [], []>} : vector<32x64xbf16>, vector<8x64xbf16>, vector<32x8xf32> -> vector<32x8xf32>
    %c9 = arith.constant 9 : index
    %c0_53 = arith.constant 0 : index
    %c0_54 = arith.constant 0 : index
    %45 = vector.load %arg1[%c9, %c0_53, %c0_54] : memref<16x32x64xbf16, #tpu.memory_space<vmem>>, vector<1x32x64xbf16>
    %46 = vector.shape_cast %45 : vector<1x32x64xbf16> to vector<32x64xbf16>
    %c9_55 = arith.constant 9 : index
    %c0_56 = arith.constant 0 : index
    %c0_57 = arith.constant 0 : index
    %47 = vector.load %arg2[%c9_55, %c0_56, %c0_57] : memref<16x8x64xbf16, #tpu.memory_space<vmem>>, vector<1x8x64xbf16>
    %48 = vector.shape_cast %47 : vector<1x8x64xbf16> to vector<8x64xbf16>
    %cst_58 = arith.constant dense<0.000000e+00> : vector<32x8xf32>
    %49 = tpu.matmul %46, %48, %cst_58 {dimension_numbers = #tpu.dot_dimension_numbers<[1], [1], [0], [0], [0, 0, 1, 0], [], []>} : vector<32x64xbf16>, vector<8x64xbf16>, vector<32x8xf32> -> vector<32x8xf32>
    %c10 = arith.constant 10 : index
    %c0_59 = arith.constant 0 : index
    %c0_60 = arith.constant 0 : index
    %50 = vector.load %arg1[%c10, %c0_59, %c0_60] : memref<16x32x64xbf16, #tpu.memory_space<vmem>>, vector<1x32x64xbf16>
    %51 = vector.shape_cast %50 : vector<1x32x64xbf16> to vector<32x64xbf16>
    %c10_61 = arith.constant 10 : index
    %c0_62 = arith.constant 0 : index
    %c0_63 = arith.constant 0 : index
    %52 = vector.load %arg2[%c10_61, %c0_62, %c0_63] : memref<16x8x64xbf16, #tpu.memory_space<vmem>>, vector<1x8x64xbf16>
    %53 = vector.shape_cast %52 : vector<1x8x64xbf16> to vector<8x64xbf16>
    %cst_64 = arith.constant dense<0.000000e+00> : vector<32x8xf32>
    %54 = tpu.matmul %51, %53, %cst_64 {dimension_numbers = #tpu.dot_dimension_numbers<[1], [1], [0], [0], [0, 0, 1, 0], [], []>} : vector<32x64xbf16>, vector<8x64xbf16>, vector<32x8xf32> -> vector<32x8xf32>
    %c11 = arith.constant 11 : index
    %c0_65 = arith.constant 0 : index
    %c0_66 = arith.constant 0 : index
    %55 = vector.load %arg1[%c11, %c0_65, %c0_66] : memref<16x32x64xbf16, #tpu.memory_space<vmem>>, vector<1x32x64xbf16>
    %56 = vector.shape_cast %55 : vector<1x32x64xbf16> to vector<32x64xbf16>
    %c11_67 = arith.constant 11 : index
    %c0_68 = arith.constant 0 : index
    %c0_69 = arith.constant 0 : index
    %57 = vector.load %arg2[%c11_67, %c0_68, %c0_69] : memref<16x8x64xbf16, #tpu.memory_space<vmem>>, vector<1x8x64xbf16>
    %58 = vector.shape_cast %57 : vector<1x8x64xbf16> to vector<8x64xbf16>
    %cst_70 = arith.constant dense<0.000000e+00> : vector<32x8xf32>
    %59 = tpu.matmul %56, %58, %cst_70 {dimension_numbers = #tpu.dot_dimension_numbers<[1], [1], [0], [0], [0, 0, 1, 0], [], []>} : vector<32x64xbf16>, vector<8x64xbf16>, vector<32x8xf32> -> vector<32x8xf32>
    %c12 = arith.constant 12 : index
    %c0_71 = arith.constant 0 : index
    %c0_72 = arith.constant 0 : index
    %60 = vector.load %arg1[%c12, %c0_71, %c0_72] : memref<16x32x64xbf16, #tpu.memory_space<vmem>>, vector<1x32x64xbf16>
    %61 = vector.shape_cast %60 : vector<1x32x64xbf16> to vector<32x64xbf16>
    %c12_73 = arith.constant 12 : index
    %c0_74 = arith.constant 0 : index
    %c0_75 = arith.constant 0 : index
    %62 = vector.load %arg2[%c12_73, %c0_74, %c0_75] : memref<16x8x64xbf16, #tpu.memory_space<vmem>>, vector<1x8x64xbf16>
    %63 = vector.shape_cast %62 : vector<1x8x64xbf16> to vector<8x64xbf16>
    %cst_76 = arith.constant dense<0.000000e+00> : vector<32x8xf32>
    %64 = tpu.matmul %61, %63, %cst_76 {dimension_numbers = #tpu.dot_dimension_numbers<[1], [1], [0], [0], [0, 0, 1, 0], [], []>} : vector<32x64xbf16>, vector<8x64xbf16>, vector<32x8xf32> -> vector<32x8xf32>
    %c13 = arith.constant 13 : index
    %c0_77 = arith.constant 0 : index
    %c0_78 = arith.constant 0 : index
    %65 = vector.load %arg1[%c13, %c0_77, %c0_78] : memref<16x32x64xbf16, #tpu.memory_space<vmem>>, vector<1x32x64xbf16>
    %66 = vector.shape_cast %65 : vector<1x32x64xbf16> to vector<32x64xbf16>
    %c13_79 = arith.constant 13 : index
    %c0_80 = arith.constant 0 : index
    %c0_81 = arith.constant 0 : index
    %67 = vector.load %arg2[%c13_79, %c0_80, %c0_81] : memref<16x8x64xbf16, #tpu.memory_space<vmem>>, vector<1x8x64xbf16>
    %68 = vector.shape_cast %67 : vector<1x8x64xbf16> to vector<8x64xbf16>
    %cst_82 = arith.constant dense<0.000000e+00> : vector<32x8xf32>
    %69 = tpu.matmul %66, %68, %cst_82 {dimension_numbers = #tpu.dot_dimension_numbers<[1], [1], [0], [0], [0, 0, 1, 0], [], []>} : vector<32x64xbf16>, vector<8x64xbf16>, vector<32x8xf32> -> vector<32x8xf32>
    %c14 = arith.constant 14 : index
    %c0_83 = arith.constant 0 : index
    %c0_84 = arith.constant 0 : index
    %70 = vector.load %arg1[%c14, %c0_83, %c0_84] : memref<16x32x64xbf16, #tpu.memory_space<vmem>>, vector<1x32x64xbf16>
    %71 = vector.shape_cast %70 : vector<1x32x64xbf16> to vector<32x64xbf16>
    %c14_85 = arith.constant 14 : index
    %c0_86 = arith.constant 0 : index
    %c0_87 = arith.constant 0 : index
    %72 = vector.load %arg2[%c14_85, %c0_86, %c0_87] : memref<16x8x64xbf16, #tpu.memory_space<vmem>>, vector<1x8x64xbf16>
    %73 = vector.shape_cast %72 : vector<1x8x64xbf16> to vector<8x64xbf16>
    %cst_88 = arith.constant dense<0.000000e+00> : vector<32x8xf32>
    %74 = tpu.matmul %71, %73, %cst_88 {dimension_numbers = #tpu.dot_dimension_numbers<[1], [1], [0], [0], [0, 0, 1, 0], [], []>} : vector<32x64xbf16>, vector<8x64xbf16>, vector<32x8xf32> -> vector<32x8xf32>
    %c15 = arith.constant 15 : index
    %c0_89 = arith.constant 0 : index
    %c0_90 = arith.constant 0 : index
    %75 = vector.load %arg1[%c15, %c0_89, %c0_90] : memref<16x32x64xbf16, #tpu.memory_space<vmem>>, vector<1x32x64xbf16>
    %76 = vector.shape_cast %75 : vector<1x32x64xbf16> to vector<32x64xbf16>
    %c15_91 = arith.constant 15 : index
    %c0_92 = arith.constant 0 : index
    %c0_93 = arith.constant 0 : index
    %77 = vector.load %arg2[%c15_91, %c0_92, %c0_93] : memref<16x8x64xbf16, #tpu.memory_space<vmem>>, vector<1x8x64xbf16>
    %78 = vector.shape_cast %77 : vector<1x8x64xbf16> to vector<8x64xbf16>
    %cst_94 = arith.constant dense<0.000000e+00> : vector<32x8xf32>
    %79 = tpu.matmul %76, %78, %cst_94 {dimension_numbers = #tpu.dot_dimension_numbers<[1], [1], [0], [0], [0, 0, 1, 0], [], []>} : vector<32x64xbf16>, vector<8x64xbf16>, vector<32x8xf32> -> vector<32x8xf32>
    %80 = tpu.concatenate %4, %9, %14, %19, %24, %29, %34, %39, %44, %49, %54, %59, %64, %69, %74, %79 in 1 : vector<32x8xf32>, vector<32x8xf32>, vector<32x8xf32>, vector<32x8xf32>, vector<32x8xf32>, vector<32x8xf32>, vector<32x8xf32>, vector<32x8xf32>, vector<32x8xf32>, vector<32x8xf32>, vector<32x8xf32>, vector<32x8xf32>, vector<32x8xf32>, vector<32x8xf32>, vector<32x8xf32>, vector<32x8xf32> -> vector<32x128xf32>
    %cst_95 = arith.constant dense<0.000000e+00> : vector<128xf32>
    %81 = vector.multi_reduction <add>, %80, %cst_95 [0] : vector<32x128xf32> to vector<128xf32>
    %82 = vector.shape_cast %81 : vector<128xf32> to vector<1x128xf32>
    %cst_96 = arith.constant 3.200000e+01 : f32
    %83 = vector.broadcast %cst_96 : f32 to vector<1x128xf32>
    %84 = arith.divf %82, %83 : vector<1x128xf32>
    %85 = vector.broadcast %84 : vector<1x128xf32> to vector<32x128xf32>
    %86 = arith.subf %80, %85 : vector<32x128xf32>
    %87 = arith.mulf %86, %86 : vector<32x128xf32>
    %cst_97 = arith.constant dense<0.000000e+00> : vector<128xf32>
    %88 = vector.multi_reduction <add>, %87, %cst_97 [0] : vector<32x128xf32> to vector<128xf32>
    %89 = vector.shape_cast %88 : vector<128xf32> to vector<1x128xf32>
    %cst_98 = arith.constant 3.200000e+01 : f32
    %90 = vector.broadcast %cst_98 : f32 to vector<1x128xf32>
    %91 = arith.divf %89, %90 : vector<1x128xf32>
    %c0_99 = arith.constant 0 : index
    %c0_100 = arith.constant 0 : index
    %92 = vector.load %arg3[%c0_99, %c0_100] : memref<1x128xf32, #tpu.memory_space<vmem>>, vector<1x128xf32>
    %cst_101 = arith.constant 9.99999974E-6 : f32
    %93 = vector.broadcast %cst_101 : f32 to vector<1x128xf32>
    %94 = arith.addf %91, %93 : vector<1x128xf32>
    %95 = math.rsqrt %94 : vector<1x128xf32>
    %96 = arith.mulf %92, %95 : vector<1x128xf32>
    %c0_102 = arith.constant 0 : index
    %c0_103 = arith.constant 0 : index
    %97 = vector.load %arg4[%c0_102, %c0_103] : memref<1x128xf32, #tpu.memory_space<vmem>>, vector<1x128xf32>
    %98 = arith.mulf %84, %96 : vector<1x128xf32>
    %99 = arith.subf %97, %98 : vector<1x128xf32>
    %100 = vector.broadcast %96 : vector<1x128xf32> to vector<32x128xf32>
    %101 = arith.mulf %80, %100 : vector<32x128xf32>
    %102 = vector.broadcast %99 : vector<1x128xf32> to vector<32x128xf32>
    %103 = arith.addf %101, %102 : vector<32x128xf32>
    %cst_104 = arith.constant 2.000000e-01 : f32
    %104 = vector.broadcast %cst_104 : f32 to vector<32x128xf32>
    %105 = arith.mulf %104, %103 : vector<32x128xf32>
    %106 = arith.maximumf %103, %105 : vector<32x128xf32>
    %c0_105 = arith.constant 0 : index
    %c0_106 = arith.constant 0 : index
    %107 = vector.load %arg5[%c0_105, %c0_106] : memref<32x128xf32, #tpu.memory_space<vmem>>, vector<32x128xf32>
    tpu.vector_store %arg5[%c0_105, %c0_106], %106 {strides = array<i32>} : memref<32x128xf32, #tpu.memory_space<vmem>>, vector<32x128xf32>,
    return
  }
  func.func @transform_0(%arg0: i32) -> (i32, i32, i32) {
    %c0_i32 = arith.constant 0 : i32
    %c0_i32_0 = arith.constant 0 : i32
    %c0_i32_1 = arith.constant 0 : i32
    return %arg0, %c0_i32, %c0_i32_0 : i32, i32, i32
  }
  func.func @transform_1(%arg0: i32) -> (i32, i32, i32) {
    %c0_i32 = arith.constant 0 : i32
    %c0_i32_0 = arith.constant 0 : i32
    %c0_i32_1 = arith.constant 0 : i32
    return %arg0, %c0_i32, %c0_i32_0 : i32, i32, i32
  }
  func.func @transform_2(%arg0: i32) -> (i32, i32) {
    %c0_i32 = arith.constant 0 : i32
    %c0_i32_0 = arith.constant 0 : i32
    return %c0_i32, %arg0 : i32, i32
  }
  func.func @transform_3(%arg0: i32) -> (i32, i32) {
    %c0_i32 = arith.constant 0 : i32
    %c0_i32_0 = arith.constant 0 : i32
    return %c0_i32, %arg0 : i32, i32
  }
  func.func @transform_4(%arg0: i32) -> (i32, i32) {
    %c0_i32 = arith.constant 0 : i32
    %c0_i32_0 = arith.constant 0 : i32
    return %c0_i32, %arg0 : i32, i32
  }
}

</mosaic_0001>

<bundles_post_ra>
// kernel: tpu_custom_call.1
= control target key start
LH: loop header
LB: loop body
LE: loop exit
PB: predicated region body
PF: predicated region fallthrough
CT: control target
= control target key end

     0   :  { %s2535_s0 = inlined_call_operand.hbm [shape: bf16[32,32,64], index: 0, kind: input, shape index: {}]   ;;  %s2536_s1 = inlined_call_operand.hbm [shape: bf16[32,8,64], index: 1, kind: input, shape index: {}]   ;;  %s2537_s2 = inlined_call_operand.hbm [shape: f32[1,256], index: 2, kind: input, shape index: {}]   ;;  %s2538_s3 = inlined_call_operand.vmem [shape: f32[1,256], index: 3, kind: input, shape index: {}]   ;;  %s2539_s4 = inlined_call_operand.hbm [shape: f32[32,256], index: 4, kind: output, shape index: {}]  }
   0x1   :  { %2542 = sst [smem:[#allocation13_spill]] %s2535_s0 }
   0x2   :  { %2543 = sst [smem:[#allocation14_spill]] %s2536_s1 }
   0x3   :  { %9 = vsyncpa [#allocation3], 0 }
   0x4   :  { %11 = vsyncpa [#allocation3 + $0x1], 0 }
   0x5   :  { %12 = vsyncpa [#allocation6], 0 }
   0x6   :  { %14 = vsyncpa [#allocation6 + $0x1], 0 }
   0x7   :  { %15 = vsyncpa [#allocation4], 0 }
   0x8   :  { %17 = vsyncpa [#allocation4 + $0x1], 0  ;;  %s2131_s15 = smov 0   ;;  %s2133_s16 = smov 0  }
   0x9   :  { %s2135_s17 = smov 0   ;;  %s2137_s18 = smov 0  }
   0xa LB: > { %s2152_s19 = sadd.s32 4294967295, %s2084_s18   ;;  %s1556_s20 = sadd.s32 4294967294, %s2084_s18   ;;  %s2084_s18 = sphi %s2137_s18, %s2558_s18   ;;  %s2080_s17 = sphi %s2135_s17, %s2557_s17   ;;  %s2076_s16 = sphi %s2133_s16, %s2556_s16   ;;  %s2072_s15 = sphi %s2131_s15, %s2555_s15  }
   0xb   : > { %s2156_s21 = sadd.s32 1, %s2084_s18   ;;  %s30_s22 = sadd.s32 1, %s2080_s17 }
   0xc   : > { %s27_s23 = ssub.s32 %s2084_s18, %s2156_s21  ;;  %p37_p0 = scmp.ne.s32.totalorder %s2080_s17, %s2076_s16 }
   0xd   : > { %p28_p1 = scmp.eq.s32.totalorder %s27_s23, 0  ;;  %p38_p2 = scmp.eq.s32.totalorder %s2084_s18, 0 }
   0xe   : > { %p43_p3 = scmp.ne.s32.totalorder %s2076_s16, %s2072_s15  ;;  %p44_p4 = scmp.eq.s32.totalorder %s2152_s19, 0 }
   0xf   : > { %s2168_s24 = scalar_select %p28_p1, %s2080_s17, %s30_s22  }
  0x10   : > { %p39_p5 = por %p38_p2, %p37_p0  ;;  %p2170_p6 = por %p44_p4, %p43_p3 }
  0x11   : > { %2544 = sst [smem:[#allocation12_spill]] %s2168_s24  ;;  %p145_p7 = scmp.eq.s32.totalorder %s2152_s19, 1 }
  0x12   : > { %p151_p8 = scmp.eq.s32.totalorder %s1556_s20, 1  ;;  %p1558_p9 = scmp.ge.s32.totalorder %s2084_s18, 2 }
  0x13   : > { %p1866_p10 = scmp.lt.s32.totalorder %s2084_s18, 2  ;;  %p2177_p11 = por %p145_p7, %p37_p0 }
  0x14   : > { %p2181_p12 = por %p151_p8, %p43_p3  ;;  %s2186_s28 = sand.u32 1, %s2080_s17  }
  0x15   : > { %p2188_p13 = pnand %p1866_p10, %p39_p5  ;;  %s194_s30 = sand.u32 1, %s2084_s18  }
  0x16   : > { %s1563_s5 = sshll.u32 %s2186_s28, 6  ;;  %s1811_s6 = sshll.u32 %s2084_s18, 6 }
  0x17   : > { %s2549_s1 = sld [smem:[#allocation14_spill]]  ;;  %s198_s10 = scalar_lea.vmem [#allocation5], %s1563_s5 }
  0x18   : > { %s206_s11 = sshll.u32 %s198_s10, 4  ;;  %p1566_p0 = scmp.ge.s32.totalorder %s2084_s18, 1  ;;  %s207_s11 = int_to_ptr.vmem [resolvable:$true] %s206_s11 }
  0x19   : > { %s2199_s13 = scalar_lea.sflag [#allocation6], %s194_s30  ;;  %p1928_p2 = pneg %p2188_p13 }
  0x1d   : > { %s203_s9 = scalar_lea.hbm %s2549_s1, %s1811_s6  ;;  %s1931_s5 = scalar_lea.hbm %s2549_s1, 128 }
  0x1e   : > { %s204_s12 = sshll.u32 %s203_s9, 4  ;;  %s205_s12 = int_to_ptr.hbm [resolvable:$true] %s204_s12 }
  0x1f   : > { %s1924_s14 = sshra.s32 %s205_s12, 4  ;;  %s1925_s14 = int_to_ptr.hbm [resolvable:$true] %s1924_s14 }
  0x20   : > { %s1926_s20 = scalar_lea.hbm %s1925_s14, 64  ;;  %p1932_p5 = scmp.lt.s32.totalorder %s1925_s14, %s2549_s1 }
  0x21   : > { %p1927_p1 = scmp.ne.s32.totalorder %s1925_s14, %s1926_s20  ;;  %p1933_p7 = scmp.lt.s32.totalorder %s1931_s5, %s1926_s20 }
  0x23   : > { %p1929_p3 = pnand %p1928_p2, %p1927_p1  ;;  %p1934_p8 = por %p1933_p7, %p1932_p5 }
  0x25   : > { %p1930_p4 = pneg %p1929_p3 }
  0x27   : > { %p1935_p10 = pnand %p1934_p8, %p1930_p4 }
  0x29   : > { %1938 = shalt.err (!%p1935_p10)
}
  0x2a   : > { %s2540_s30 = smov 64   ;;  %s2541_s8 = smov 4  }
  0x2b   : > { %1858 = dma.hbm_to_vmem [thread:$0]  (!%p2188_p13), %s205_s12, 1024, %s207_s11, %s2199_s13, %s2540_s30, %s2540_s30, %s2541_s8  }
  0x2c   : > { %p237_p1 = scmp.lt.s32.totalorder %s2084_s18, 3  ;;  %s1559_s9 = sshll.u32 %s2186_s28, 8 }
  0x2d   : > { %s1810_s10 = sshll.u32 %s2084_s18, 8  ;;  %s2551_s0 = sld [smem:[#allocation13_spill]] }
  0x2e   : > { %p2223_p3 = pnand %p1566_p0, %p237_p1  ;;  %s175_s5 = scalar_lea.vmem [#allocation2], %s1559_s9 }
  0x2f   : > { %s184_s6 = sshll.u32 %s175_s5, 4  ;;  %s172_s1 = scalar_lea.sflag [#allocation3], %s2186_s28  ;;  %s185_s6 = int_to_ptr.vmem [resolvable:$true] %s184_s6 }
  0x33   : > { %s181_s23 = scalar_lea.hbm %s2551_s0, %s1810_s10  ;;  %s1961_s24 = scalar_lea.hbm %s2551_s0, 512 }
  0x34   : > { %s182_s7 = sshll.u32 %s181_s23, 4  ;;  %s183_s7 = int_to_ptr.hbm [resolvable:$true] %s182_s7 }
  0x35   : > { %s1954_s11 = sshra.s32 %s183_s7, 4  ;;  %s1955_s11 = int_to_ptr.hbm [resolvable:$true] %s1954_s11 }
  0x36   : > { %s1956_s12 = scalar_lea.hbm %s1955_s11, 256  ;;  %p1962_p7 = scmp.lt.s32.totalorder %s1955_s11, %s2551_s0 }
  0x37   : > { %p1957_p4 = scmp.ne.s32.totalorder %s1955_s11, %s1956_s12  ;;  %p1963_p8 = scmp.lt.s32.totalorder %s1961_s24, %s1956_s12 }
  0x39   : > { %p1959_p0 = pnand %p1957_p4, %p1928_p2  ;;  %p1964_p10 = por %p1963_p8, %p1962_p7 }
  0x3b   : > { %p1960_p5 = pneg %p1959_p0 }
  0x3d   : > { %p1965_p1 = pnand %p1964_p10, %p1960_p5 }
  0x3f   : > { %1968 = shalt.err (!%p1965_p1)
}
  0x40   : > { %s2552_s9 = smov 4   ;;  %s2553_s22 = smov 64  }
  0x41   : > { %1855 = dma.hbm_to_vmem [thread:$0]  (!%p2188_p13), %s183_s7, 4096, %s185_s6, %s172_s1, %s2553_s22, %s2553_s22, %s2552_s9  }
  0x42   : > { %s222_s8 = scalar_lea.hbm %s2537_s2, %s2084_s18  ;;  %s219_s5 = scalar_lea.vmem [#allocation7], %s2186_s28 }
  0x43   : > { %s226_s20 = sshll.u32 %s219_s5, 4  ;;  %s224_s11 = sshll.u32 %s222_s8, 4  ;;  %s227_s20 = int_to_ptr.vmem [resolvable:$true] %s226_s20  ;;  %s225_s11 = int_to_ptr.hbm [resolvable:$true] %s224_s11 }
  0x44   : > { %s1984_s24 = sshra.s32 %s225_s11, 4  ;;  %s1991_s1 = scalar_lea.hbm %s2537_s2, 2  ;;  %s1985_s24 = int_to_ptr.hbm [resolvable:$true] %s1984_s24 }
  0x45   : > { %s1986_s12 = scalar_lea.hbm %s1985_s24, 1  ;;  %p1992_p7 = scmp.lt.s32.totalorder %s1985_s24, %s2537_s2 }
  0x46   : > { %p1987_p4 = scmp.ne.s32.totalorder %s1985_s24, %s1986_s12  ;;  %p1993_p8 = scmp.lt.s32.totalorder %s1991_s1, %s1986_s12 }
  0x48   : > { %p1989_p0 = pnand %p1987_p4, %p1928_p2  ;;  %p1994_p10 = por %p1993_p8, %p1992_p7 }
  0x4a   : > { %p1990_p5 = pneg %p1989_p0 }
  0x4c   : > { %p1995_p1 = pnand %p1994_p10, %p1990_p5 }
  0x4e   : > { %1998 = shalt.err (!%p1995_p1)
}
  0x4f   : > { %1861 = dma.hbm_to_vmem [thread:$0]  (!%p2188_p13), %s225_s11, 16, %s227_s20, %s2199_s13  }
  0x50   : > { %241 = sbr.rel (%p2223_p3) target bundleno = 592 (0x250), region = 36  ;;  %s2265_s28 = sand.u32 (!%p2223_p3), 1, %s2076_s16  }
  0x51   : > { %s1567_s0 = sshll.u32 (!%p2223_p3), %s2265_s28, 8  ;;  %s244_s9 = scalar_lea.sflag (!%p2223_p3), [#allocation3], %s2265_s28 }
  0x52   : > { %s2269_s22 = scalar_lea.vmem (!%p2223_p3), [#allocation2], %s1567_s0 }
  0x55   : > { %2059 = dma.done.wait (%p2170_p6), %s244_s9, 4096  }
  0x56   : > { %2061 = vsyncadd (%p2170_p6), %s244_s9, 4294963200  ;;  %s253_s29 = sand.u32 1, %s2152_s19   ;;  %s1568_s13 = sshll.u32 %s2265_s28, 6 }
  0x57   : > { %s254_s14 = scalar_lea.sflag [#allocation6], %s253_s29  ;;  %s2277_s23 = scalar_lea.vmem [#allocation5], %s1568_s13 }
  0x58   : > { %2063 = dma.done.wait (%p2170_p6), %s254_s14, 1040  }
  0x59   : > { %2065 = vsyncadd (%p2170_p6), %s254_s14, 4294966256  ;;  %vm325_vm0 = vcmask 523264   ;;  %v314_v0 = vld [vmem:[%s2277_s23] sm:$0xf]  ;;  %v1584_v1 = vld [vmem:[%s2277_s23 + $0x4] sm:$0xf] }
  0x5a   : > { %v1599_v2 = vld [vmem:[%s2277_s23 + $0x8] sm:$0xf]  ;;  %v333_v3 = vsel %vm325_vm0, %v314_v0, 0  ;;  %v378_v4 = vsel %vm325_vm0, %v1584_v1, 0  ;;  %v1614_v6 = vld [vmem:[%s2277_s23 + $0xc] sm:$0xf] }
  0x5b   : > { %v423_v5 = vsel %vm325_vm0, %v1599_v2, 0  ;;  %342 = vmatpush.bf16.xpose.msra.mxu0 %v333_v3  ;;  %387 = vmatpush.bf16.xpose.msra.mxu1 %v378_v4  ;;  %v468_v7 = vsel %vm325_vm0, %v1614_v6, 0  ;;  %v1629_v8 = vld [vmem:[%s2277_s23 + $0x10] sm:$0xf]  ;;  %v1644_v10 = vld [vmem:[%s2277_s23 + $0x14] sm:$0xf] }
  0x5c   : > { %432 = vmatpush.bf16.xpose.msra.mxu2 %v423_v5  ;;  %477 = vmatpush.bf16.xpose.msra.mxu3 %v468_v7  ;;  %v513_v9 = vsel %vm325_vm0, %v1629_v8, 0  ;;  %v1659_v11 = vld [vmem:[%s2277_s23 + $0x18] sm:$0xf]  ;;  %v1812_v12 = vld [vmem:[%s2269_s22] sm:$0xff]  ;;  %v1814_v13 = vld [vmem:[%s2269_s22 + $0x10] sm:$0xff]  ;;  %v558_v14 = vsel %vm325_vm0, %v1644_v10, 0 }
  0x5d   : > { %v603_v15 = vsel %vm325_vm0, %v1659_v11, 0  ;;  %v1674_v16 = vld [vmem:[%s2277_s23 + $0x1c] sm:$0xf]  ;;  %v1816_v17 = vld [vmem:[%s2269_s22 + $0x20] sm:$0xff]  ;;  %v1818_v18 = vld [vmem:[%s2269_s22 + $0x30] sm:$0xff]  ;;  %s2088_s25 = smov 8  }
  0x5e   : > { %v648_v19 = vsel %vm325_vm0, %v1674_v16, 0  ;;  %v1813_v20 = vld [vmem:[%s2269_s22 + $0x8] sm:$0xff]  ;;  %v1815_v21 = vld [vmem:[%s2269_s22 + $0x18] sm:$0xff]  ;;  %v1689_v24 = vld [vmem:[%s2277_s23 + $0x20] sm:$0xf]  ;;  %s2089_s30 = smov 16  }
  0x5f   : > { %v1819_v22 = vld [vmem:[%s2269_s22 + $0x38] sm:$0xff]  ;;  %v1817_v23 = vld [vmem:[%s2269_s22 + $0x28] sm:$0xff]  ;;  %v1704_v25 = vld [vmem:[%s2277_s23 + $0x24] sm:$0xf]  ;;  %v693_v26 = vsel %vm325_vm0, %v1689_v24, 0  ;;  %s2090_s8 = smov 24  }
  0x60   : > { %v738_v27 = vsel %vm325_vm0, %v1704_v25, 0  ;;  %v1734_v28 = vld [vmem:[%s2277_s23 + $0x2c] sm:$0xf]  ;;  %v1719_v30 = vld [vmem:[%s2277_s23 + $0x28] sm:$0xf]  ;;  %v1820_v32 = vld [vmem:[%s2269_s22 + $0x40] sm:$0xff] }
  0x61   : > { %v828_v29 = vsel %vm325_vm0, %v1734_v28, 0  ;;  %v783_v31 = vsel %vm325_vm0, %v1719_v30, 0  ;;  %v1822_v33 = vld [vmem:[%s2269_s22 + $0x50] sm:$0xff]  ;;  %v1824_v34 = vld [vmem:[%s2269_s22 + $0x60] sm:$0xff]  ;;  %v1821_v36 = vld [vmem:[%s2269_s22 + $0x48] sm:$0xff]  ;;  %s2091_s5 = smov 32  }
  0x62   : > { %1578 = vmatmul.msk.bf16.vlgmr.msra.gmra.mxu0 %vm325_vm0, %v1812_v12  ;;  %1593 = vmatmul.msk.bf16.vlgmr.msra.gmra.mxu1 %vm325_vm0, %v1814_v13  ;;  %v1826_v35 = vld [vmem:[%s2269_s22 + $0x70] sm:$0xff]  ;;  %v1823_v37 = vld [vmem:[%s2269_s22 + $0x58] sm:$0xff]  ;;  %v1825_v39 = vld [vmem:[%s2269_s22 + $0x68] sm:$0xff]  ;;  %s2092_s20 = smov 40   ;;  %s2093_s11 = smov 48   ;;  %vm1269_vm1 = vcmask 64512  }
  0x63   : > { %522 = vmatpush.bf16.xpose.msrb.mxu0 %v513_v9  ;;  %567 = vmatpush.bf16.xpose.msrb.mxu1 %v558_v14  ;;  %v1827_v38 = vld [vmem:[%s2269_s22 + $0x78] sm:$0xff]  ;;  %v1749_v42 = vld [vmem:[%s2277_s23 + $0x30] sm:$0xf]  ;;  %v1764_v43 = vld [vmem:[%s2277_s23 + $0x34] sm:$0xf]  ;;  %s2094_s24 = smov 56  }
  0x64   : > { %612 = vmatpush.bf16.xpose.msrb.mxu2 %v603_v15  ;;  %657 = vmatpush.bf16.xpose.msrb.mxu3 %v648_v19  ;;  %v1779_v40 = vld [vmem:[%s2277_s23 + $0x38] sm:$0xf]  ;;  %v873_v44 = vsel %vm325_vm0, %v1749_v42, 0  ;;  %v918_v45 = vsel %vm325_vm0, %v1764_v43, 0  ;;  %v1794_v46 = vld [vmem:[%s2277_s23 + $0x3c] sm:$0xf] }
  0x65   : > { %1608 = vmatmul.msk.bf16.vlgmr.msra.gmra.mxu2 %vm325_vm0, %v1816_v17  ;;  %1623 = vmatmul.msk.bf16.vlgmr.msra.gmra.mxu3 %vm325_vm0, %v1818_v18  ;;  %v963_v41 = vsel %vm325_vm0, %v1779_v40, 0  ;;  %v1008_v47 = vsel %vm325_vm0, %v1794_v46, 0  ;;  %v1828_v48 = vld [vmem:[%s2269_s22 + $0x80] sm:$0xff]  ;;  %v1830_v49 = vld [vmem:[%s2269_s22 + $0x90] sm:$0xff]  ;;  %v1829_v52 = vld [vmem:[%s2269_s22 + $0x88] sm:$0xff]  ;;  %s2095_s12 = smov 80  }
  0x66   : > { %v1832_v50 = vld [vmem:[%s2269_s22 + $0xa0] sm:$0xff]  ;;  %v1834_v51 = vld [vmem:[%s2269_s22 + $0xb0] sm:$0xff]  ;;  %v1831_v53 = vld [vmem:[%s2269_s22 + $0x98] sm:$0xff]  ;;  %s2096_s10 = smov 64   ;;  %s2097_s1 = smov 72   ;;  %vm1274_vm2 = vcmask 130048  }
  0x67   : > { %v1833_v54 = vld [vmem:[%s2269_s22 + $0xa8] sm:$0xff]  ;;  %v1835_v55 = vld [vmem:[%s2269_s22 + $0xb8] sm:$0xff]  ;;  %v1836_v56 = vld [vmem:[%s2269_s22 + $0xc0] sm:$0xff]  ;;  %s2098_s6 = smov 88   ;;  %vm1279_vm3 = vcmask 195584   ;;  %s2099_s7 = smov 104  }
  0x68   : > { %v1838_v57 = vld [vmem:[%s2269_s22 + $0xd0] sm:$0xff]  ;;  %v1840_v58 = vld [vmem:[%s2269_s22 + $0xe0] sm:$0xff]  ;;  %v1837_v60 = vld [vmem:[%s2269_s22 + $0xc8] sm:$0xff]  ;;  %s2100_s0 = smov 112   ;;  %s2101_s9 = smov 96   ;;  %vm1284_vm4 = vcmask 261120  }
  0x69   : > { %v1842_v59 = vld [vmem:[%s2269_s22 + $0xf0] sm:$0xff]  ;;  %v1839_v61 = vld [vmem:[%s2269_s22 + $0xd8] sm:$0xff]  ;;  %v1841_v62 = vld [vmem:[%s2269_s22 + $0xe8] sm:$0xff]  ;;  %vm1289_vm5 = vcmask 326656   ;;  %vm1294_vm6 = vcmask 392192   ;;  %vm1299_vm7 = vcmask 457728  }
  0x6a   : > { %v1843_v63 = vld [vmem:[%s2269_s22 + $0xf8] sm:$0xff]  ;;  %s2102_s22 = smov 120   ;;  %vm1308_vm8 = vcmask 588800   ;;  %vm1313_vm9 = vcmask 654336   ;;  %vm1318_vm10 = vcmask 719872   ;;  %vm1323_vm11 = vcmask 785408  }
  0x6b   : > { %702 = vmatpush.bf16.xpose.msra.mxu0 %v693_v26  ;;  %747 = vmatpush.bf16.xpose.msra.mxu1 %v738_v27  ;;  %vm1328_vm12 = vcmask 850944   ;;  %vm1333_vm13 = vcmask 916480   ;;  %vm1338_vm14 = vcmask 982016   ;;  %p306_p6 = scmp.lt.s32.totalorder %s2152_s19, 1  ;;  %s266_s13 = scalar_lea.vmem [#allocation7], %s2265_s28 }
  0x6c   : > { %837 = vmatpush.bf16.xpose.msra.mxu3 %v828_v29  ;;  %792 = vmatpush.bf16.xpose.msra.mxu2 %v783_v31 }
  0x6d   : > { %s307_s29 = scalar_select %p306_p6, %s2152_s19, 1 }
  0x72   : > { %1579 = vmatmul.msk.bf16.gmra.mxu0 %vm325_vm0, %v1813_v20  ;;  %1594 = vmatmul.msk.bf16.gmra.mxu1 %vm325_vm0, %v1815_v21 }
  0x75   : > { %1624 = vmatmul.msk.bf16.gmra.mxu3 %vm325_vm0, %v1819_v22  ;;  %1609 = vmatmul.msk.bf16.gmra.mxu2 %vm325_vm0, %v1817_v23 }
  0x82   : > { %1638 = vmatmul.msk.bf16.vlgmr.msrb.gmra.mxu0 %vm325_vm0, %v1820_v32  ;;  %1653 = vmatmul.msk.bf16.vlgmr.msrb.gmra.mxu1 %vm325_vm0, %v1822_v33 }
  0x83   : > { %882 = vmatpush.bf16.xpose.msrb.mxu0 %v873_v44  ;;  %927 = vmatpush.bf16.xpose.msrb.mxu1 %v918_v45 }
  0x85   : > { %1668 = vmatmul.msk.bf16.vlgmr.msrb.gmra.mxu2 %vm325_vm0, %v1824_v34  ;;  %1683 = vmatmul.msk.bf16.vlgmr.msrb.gmra.mxu3 %vm325_vm0, %v1826_v35 }
  0x86   : > { %972 = vmatpush.bf16.xpose.msrb.mxu2 %v963_v41  ;;  %1017 = vmatpush.bf16.xpose.msrb.mxu3 %v1008_v47 }
  0x92   : > { %1639 = vmatmul.msk.bf16.gmra.mxu0 %vm325_vm0, %v1821_v36  ;;  %1654 = vmatmul.msk.bf16.gmra.mxu1 %vm325_vm0, %v1823_v37 }
  0x95   : > { %1684 = vmatmul.msk.bf16.gmra.mxu3 %vm325_vm0, %v1827_v38  ;;  %1669 = vmatmul.msk.bf16.gmra.mxu2 %vm325_vm0, %v1825_v39 }
  0xa2   : > { %1698 = vmatmul.msk.bf16.vlgmr.msra.gmra.mxu0 %vm325_vm0, %v1828_v48  ;;  %1713 = vmatmul.msk.bf16.vlgmr.msra.gmra.mxu1 %vm325_vm0, %v1830_v49 }
  0xa5   : > { %1728 = vmatmul.msk.bf16.vlgmr.msra.gmra.mxu2 %vm325_vm0, %v1832_v50  ;;  %1743 = vmatmul.msk.bf16.vlgmr.msra.gmra.mxu3 %vm325_vm0, %v1834_v51 }
  0xb2   : > { %1699 = vmatmul.msk.bf16.gmra.mxu0 %vm325_vm0, %v1829_v52  ;;  %1714 = vmatmul.msk.bf16.gmra.mxu1 %vm325_vm0, %v1831_v53 }
  0xb5   : > { %1729 = vmatmul.msk.bf16.gmra.mxu2 %vm325_vm0, %v1833_v54  ;;  %1744 = vmatmul.msk.bf16.gmra.mxu3 %vm325_vm0, %v1835_v55 }
  0xc2   : > { %1758 = vmatmul.msk.bf16.vlgmr.msrb.gmra.mxu0 %vm325_vm0, %v1836_v56  ;;  %1773 = vmatmul.msk.bf16.vlgmr.msrb.gmra.mxu1 %vm325_vm0, %v1838_v57 }
  0xc5   : > { %1788 = vmatmul.msk.bf16.vlgmr.msrb.gmra.mxu2 %vm325_vm0, %v1840_v58  ;;  %1803 = vmatmul.msk.bf16.vlgmr.msrb.gmra.mxu3 %vm325_vm0, %v1842_v59 }
  0xd2   : > { %1759 = vmatmul.msk.bf16.gmra.mxu0 %vm325_vm0, %v1837_v60  ;;  %1774 = vmatmul.msk.bf16.gmra.mxu1 %vm325_vm0, %v1839_v61 }
  0xd5   : > { %1789 = vmatmul.msk.bf16.gmra.mxu2 %vm325_vm0, %v1841_v62  ;;  %1804 = vmatmul.msk.bf16.gmra.mxu3 %vm325_vm0, %v1843_v63 }
  0xdf   : > { %v2379_v0 = vpop.f32.mrf.mxu0  ;;  %v389_v1 = vpop.f32.mrf.mxu1 }
  0xe0   : > { %1033 = vrot.lane.b32.xlu0 %v389_v1, %s2088_s25 }
  0xe7   : > { %v2383_v4 = vpop.f32.mrf.mxu0  ;;  %v391_v5 = vpop.f32.mrf.mxu1 }
  0xe8   : > { %v434_v2 = vpop.f32.mrf.mxu2  ;;  %v479_v3 = vpop.f32.mrf.mxu3  ;;  %1035 = vrot.lane.b32.xlu0 %v391_v5, %s2088_s25 }
  0xe9   : > { %1049 = vrot.lane.b32.xlu2 %v434_v2, %s2089_s30 }
  0xef   : > { %v2386_v8 = vpop.f32.mrf.mxu0  ;;  %v394_v9 = vpop.f32.mrf.mxu1 }
  0xf0   : > { %v481_v6 = vpop.f32.mrf.mxu3  ;;  %v436_v7 = vpop.f32.mrf.mxu2  ;;  %1037 = vrot.lane.b32.xlu1 %v394_v9, %s2088_s25 }
  0xf1   : > { %1065 = vrot.lane.b32.xlu2 %v479_v3, %s2090_s8  ;;  %1067 = vrot.lane.b32.xlu0 %v481_v6, %s2090_s8 }
  0xf7   : > { %v2390_v12 = vpop.f32.mrf.mxu0  ;;  %v396_v13 = vpop.f32.mrf.mxu1 }
  0xf8   : > { %v484_v10 = vpop.f32.mrf.mxu3  ;;  %v439_v11 = vpop.f32.mrf.mxu2 }
  0xf9   : > { %1051 = vrot.lane.b32.xlu2 %v436_v7, %s2089_s30  ;;  %1053 = vrot.lane.b32.xlu0 %v439_v11, %s2089_s30 }
  0xfa   : > { %1069 = vrot.lane.b32.xlu1 %v484_v10, %s2090_s8 }
  0xff   : > { %v524_v16 = vpop.f32.mrf.mxu0  ;;  %v569_v17 = vpop.f32.mrf.mxu1 }
 0x100   : > { %v486_v14 = vpop.f32.mrf.mxu3  ;;  %v441_v15 = vpop.f32.mrf.mxu2 }
 0x101   : > { %1071 = vrot.lane.b32.xlu2 %v486_v14, %s2090_s8  ;;  %1081 = vrot.lane.b32.xlu0 %v524_v16, %s2091_s5  ;;  %s1569_s8 = sshll.u32 %s2265_s28, 5 }
 0x102   : > { %1039 = vrot.lane.b32.xlu1 %v396_v13, %s2088_s25 }
 0x107   : > { %v526_v20 = vpop.f32.mrf.mxu0  ;;  %v571_v21 = vpop.f32.mrf.mxu1 }
 0x108   : > { %v614_v18 = vpop.f32.mrf.mxu2  ;;  %v659_v19 = vpop.f32.mrf.mxu3 }
 0x109   : > { %1099 = vrot.lane.b32.xlu2 %v571_v21, %s2092_s20  ;;  %1113 = vrot.lane.b32.xlu0 %v614_v18, %s2093_s11 }
 0x10a   : > { %1055 = vrot.lane.b32.xlu1 %v441_v15, %s2089_s30  ;;  %s308_s30 = scalar_lea.vmem %s2538_s3, %s307_s29 }
 0x10f   : > { %v529_v23 = vpop.f32.mrf.mxu0  ;;  %v574_v25 = vpop.f32.mrf.mxu1 }
 0x110   : > { %v661_v22 = vpop.f32.mrf.mxu3  ;;  %v616_v24 = vpop.f32.mrf.mxu2 }
 0x111   : > { %1085 = vrot.lane.b32.xlu2 %v529_v23, %s2091_s5  ;;  %1129 = vrot.lane.b32.xlu0 %v659_v19, %s2094_s24 }
 0x112   : > { %1097 = vrot.lane.b32.xlu1 %v569_v17, %s2092_s20 }
 0x117   : > { %v531_v28 = vpop.f32.mrf.mxu0  ;;  %v576_v29 = vpop.f32.mrf.mxu1 }
 0x118   : > { %v664_v26 = vpop.f32.mrf.mxu3  ;;  %v619_v27 = vpop.f32.mrf.mxu2 }
 0x119   : > { %1101 = vrot.lane.b32.xlu2 %v574_v25, %s2092_s20  ;;  %1133 = vrot.lane.b32.xlu0 %v664_v26, %s2094_s24 }
 0x11a   : > { %1083 = vrot.lane.b32.xlu1 %v526_v20, %s2091_s5 }
 0x11f   : > { %v704_v32 = vpop.f32.mrf.mxu0  ;;  %v749_v33 = vpop.f32.mrf.mxu1 }
 0x120   : > { %v621_v30 = vpop.f32.mrf.mxu2  ;;  %v666_v31 = vpop.f32.mrf.mxu3 }
 0x121   : > { %1117 = vrot.lane.b32.xlu2 %v619_v27, %s2093_s11  ;;  %1087 = vrot.lane.b32.xlu0 %v531_v28, %s2091_s5  ;;  %s1806_s5 = sshll.u32 %s2152_s19, 3 }
 0x122   : > { %1115 = vrot.lane.b32.xlu1 %v616_v24, %s2093_s11 }
 0x127   : > { %v706_v36 = vpop.f32.mrf.mxu0  ;;  %v751_v37 = vpop.f32.mrf.mxu1 }
 0x128   : > { %v794_v34 = vpop.f32.mrf.mxu2  ;;  %v839_v35 = vpop.f32.mrf.mxu3 }
 0x129   : > { %1103 = vrot.lane.b32.xlu2 %v576_v29, %s2092_s20  ;;  %1119 = vrot.lane.b32.xlu0 %v621_v30, %s2093_s11 }
 0x12a   : > { %1131 = vrot.lane.b32.xlu1 %v661_v22, %s2094_s24 }
 0x12f   : > { %v709_v40 = vpop.f32.mrf.mxu0  ;;  %v754_v41 = vpop.f32.mrf.mxu1 }
 0x130   : > { %v796_v38 = vpop.f32.mrf.mxu2  ;;  %v841_v39 = vpop.f32.mrf.mxu3 }
 0x131   : > { %1177 = vrot.lane.b32.xlu2 %v794_v34, %s2095_s12  ;;  %1145 = vrot.lane.b32.xlu0 %v704_v32, %s2096_s10 }
 0x132   : > { %1135 = vrot.lane.b32.xlu1 %v666_v31, %s2094_s24  ;;  %s1431_s24 = scalar_lea.hbm %s2539_s4, %s1806_s5 }
 0x133   : > { %s1434_s19 = sshll.u32 %s1431_s24, 4  ;;  %s1435_s19 = int_to_ptr.hbm [resolvable:$true] %s1434_s19 }
 0x137   : > { %v711_v45 = vpop.f32.mrf.mxu0  ;;  %v756_v46 = vpop.f32.mrf.mxu1 }
 0x138   : > { %v799_v43 = vpop.f32.mrf.mxu2  ;;  %v844_v44 = vpop.f32.mrf.mxu3 }
 0x139   : > { %1163 = vrot.lane.b32.xlu2 %v751_v37, %s2097_s1  ;;  %1193 = vrot.lane.b32.xlu0 %v839_v35, %s2098_s6 }
 0x13a   : > { %1161 = vrot.lane.b32.xlu1 %v749_v33, %s2097_s1 }
 0x13f   : > { %v884_v50 = vpop.f32.mrf.mxu0  ;;  %v929_v53 = vpop.f32.mrf.mxu1 }
 0x140   : > { %v801_v48 = vpop.f32.mrf.mxu2  ;;  %v846_v49 = vpop.f32.mrf.mxu3 }
 0x141   : > { %1165 = vrot.lane.b32.xlu2 %v754_v41, %s2097_s1  ;;  %1179 = vrot.lane.b32.xlu0 %v796_v38, %s2095_s12 }
 0x142   : > { %1147 = vrot.lane.b32.xlu1 %v706_v36, %s2096_s10 }
 0x143   : > { %v1050_v42 = vpop.permute.xlu2 %1049 }
 0x147   : > { %v886_v59 = vpop.f32.mrf.mxu0  ;;  %v931_v63 = vpop.f32.mrf.mxu1 }
 0x148   : > { %v974_v57 = vpop.f32.mrf.mxu2  ;;  %v1019_v62 = vpop.f32.mrf.mxu3 }
 0x149   : > { %1151 = vrot.lane.b32.xlu2 %v711_v45, %s2096_s10  ;;  %1181 = vrot.lane.b32.xlu0 %v799_v43, %s2095_s12 }
 0x14a   : > { %1195 = vrot.lane.b32.xlu1 %v841_v39, %s2098_s6 }
 0x14b   : > { %v1066_v47 = vpop.permute.xlu2 %1065 }
 0x14f   : > { %v889_v6 = vpop.f32.mrf.mxu0  ;;  %v934_v9 = vpop.f32.mrf.mxu1 }
 0x150   : > { %v1021_v7 = vpop.f32.mrf.mxu3  ;;  %v976_v23 = vpop.f32.mrf.mxu2 }
 0x151   : > { %1199 = vrot.lane.b32.xlu2 %v846_v49, %s2098_s6  ;;  %1167 = vrot.lane.b32.xlu0 %v756_v46, %s2097_s1  ;;  %s1421_s1 = scalar_lea.sflag [#allocation4], %s2265_s28 }
 0x152   : > { %1149 = vrot.lane.b32.xlu1 %v709_v40, %s2096_s10  ;;  %v1034_v52 = vpop.permute.xlu0 %1033 }
 0x153   : > { %v1052_v51 = vpop.permute.xlu2 %1051  ;;  %v1270_v54 = vsel %vm1269_vm1, %v2379_v0, %v1034_v52 }
 0x154   : > { %v1275_v55 = vsel %vm1274_vm2, %v1270_v54, %v1050_v42 }
 0x155   : > { %v1280_v56 = vsel %vm1279_vm3, %v1275_v55, %v1066_v47 }
 0x157   : > { %v891_v17 = vpop.f32.mrf.mxu0  ;;  %v936_v24 = vpop.f32.mrf.mxu1 }
 0x158   : > { %v1024_v21 = vpop.f32.mrf.mxu3  ;;  %v979_v32 = vpop.f32.mrf.mxu2 }
 0x159   : > { %1225 = vrot.lane.b32.xlu2 %v929_v53, %s2099_s7  ;;  %1241 = vrot.lane.b32.xlu0 %v974_v57, %s2100_s0 }
 0x15a   : > { %1197 = vrot.lane.b32.xlu1 %v844_v44, %s2098_s6  ;;  %v1036_v58 = vpop.permute.xlu0 %1035  ;;  %s2028_s6 = sshra.s32 %s1435_s19, 4  ;;  %s2029_s6 = int_to_ptr.hbm [resolvable:$true] %s2028_s6 }
 0x15b   : > { %v1072_v60 = vpop.permute.xlu2 %1071  ;;  %v1271_v61 = vsel %vm1269_vm1, %v2383_v4, %v1036_v58  ;;  %p2035_p4 = scmp.lt.s32.totalorder %s2029_s6, %s2539_s4 }
 0x15c   : > { %v1276_v0 = vsel %vm1274_vm2, %v1271_v61, %v1052_v51 }
 0x160   : > { %v1026_v33 = vpop.f32.mrf.mxu3  ;;  %v981_v38 = vpop.f32.mrf.mxu2 }
 0x161   : > { %1211 = vrot.lane.b32.xlu2 %v886_v59, %s2101_s9  ;;  %1227 = vrot.lane.b32.xlu0 %v931_v63, %s2099_s7 }
 0x162   : > { %1183 = vrot.lane.b32.xlu1 %v801_v48, %s2095_s12  ;;  %v1038_v2 = vpop.permute.xlu1 %1037  ;;  %s303_s12 = scalar_lea.vmem [#allocation8], %s1569_s8 }
 0x163   : > { %v1068_v1 = vpop.permute.xlu0 %1067  ;;  %v1100_v5 = vpop.permute.xlu2 %1099  ;;  %v1272_v4 = vsel %vm1269_vm1, %v2386_v8, %v1038_v2  ;;  %s1432_s10 = sshll.u32 %s303_s12, 4  ;;  %s1433_s10 = int_to_ptr.vmem [resolvable:$true] %s1432_s10 }
 0x164   : > { %v1281_v3 = vsel %vm1279_vm3, %v1276_v0, %v1068_v1 }
 0x169   : > { %1259 = vrot.lane.b32.xlu2 %v1021_v7, %s2102_s22  ;;  %1229 = vrot.lane.b32.xlu0 %v934_v9, %s2099_s7 }
 0x16a   : > { %1209 = vrot.lane.b32.xlu1 %v884_v50, %s2101_s9 }
 0x16b   : > { %v1054_v10 = vpop.permute.xlu0 %1053  ;;  %v1086_v14 = vpop.permute.xlu2 %1085 }
 0x16c   : > { %v1070_v11 = vpop.permute.xlu1 %1069  ;;  %v1277_v13 = vsel %vm1274_vm2, %v1272_v4, %v1054_v10 }
 0x16d   : > { %v1282_v15 = vsel %vm1279_vm3, %v1277_v13, %v1070_v11 }
 0x16e   : > { %v1287_v16 = vsel %vm1284_vm4, %v1282_v15, %v1086_v14 }
 0x171   : > { %1213 = vrot.lane.b32.xlu2 %v889_v6, %s2101_s9  ;;  %1215 = vrot.lane.b32.xlu0 %v891_v17, %s2101_s9 }
 0x172   : > { %1257 = vrot.lane.b32.xlu1 %v1019_v62, %s2102_s22 }
 0x173   : > { %v1082_v19 = vpop.permute.xlu0 %1081  ;;  %v1102_v20 = vpop.permute.xlu2 %1101 }
 0x174   : > { %v1040_v18 = vpop.permute.xlu1 %1039  ;;  %v1285_v8 = vsel %vm1284_vm4, %v1280_v56, %v1082_v19  ;;  %v1292_v22 = vsel %vm1289_vm5, %v1287_v16, %v1102_v20 }
 0x175   : > { %v1273_v25 = vsel %vm1269_vm1, %v2390_v12, %v1040_v18 }
 0x179   : > { %1231 = vrot.lane.b32.xlu2 %v936_v24, %s2099_s7  ;;  %1261 = vrot.lane.b32.xlu0 %v1024_v21, %s2102_s22  ;;  %s2030_s7 = scalar_lea.hbm %s2029_s6, 32 }
 0x17a   : > { %1243 = vrot.lane.b32.xlu1 %v976_v23, %s2100_s0  ;;  %p2031_p13 = scmp.ne.s32.totalorder %s2029_s6, %s2030_s7 }
 0x17b   : > { %v1114_v28 = vpop.permute.xlu0 %1113  ;;  %v1118_v29 = vpop.permute.xlu2 %1117 }
 0x17c   : > { %v1056_v26 = vpop.permute.xlu1 %1055  ;;  %v1297_v30 = vsel %vm1294_vm6, %v1292_v22, %v1118_v29  ;;  %p2032_p2 = pnand %p2031_p13, %p2177_p11 }
 0x17d   : > { %v1278_v27 = vsel %vm1274_vm2, %v1273_v25, %v1056_v26 }
 0x17e   : > { %v1283_v31 = vsel %vm1279_vm3, %v1278_v27, %v1072_v60  ;;  %p2033_p3 = pneg %p2032_p2 }
 0x181   : > { %1263 = vrot.lane.b32.xlu2 %v1026_v33, %s2102_s22  ;;  %s2034_s22 = scalar_lea.hbm %s2539_s4, 64 }
 0x182   : > { %1245 = vrot.lane.b32.xlu1 %v979_v32, %s2100_s0  ;;  %p2036_p0 = scmp.lt.s32.totalorder %s2034_s22, %s2030_s7 }
 0x183   : > { %v1130_v12 = vpop.permute.xlu0 %1129  ;;  %v1104_v44 = vpop.permute.xlu2 %1103 }
 0x184   : > { %v1098_v34 = vpop.permute.xlu1 %1097  ;;  %p2037_p5 = por %p2036_p0, %p2035_p4 }
 0x185   : > { %v1290_v35 = vsel %vm1289_vm5, %v1285_v8, %v1098_v34 }
 0x186   : > { %v1295_v36 = vsel %vm1294_vm6, %v1290_v35, %v1114_v28  ;;  %p2038_p7 = pnand %p2037_p5, %p2033_p3 }
 0x187   : > { %v1300_v37 = vsel %vm1299_vm7, %v1295_v36, %v1130_v12 }
 0x18a   : > { %1247 = vrot.lane.b32.xlu1 %v981_v38, %s2100_s0 }
 0x18b   : > { %v1134_v40 = vpop.permute.xlu0 %1133  ;;  %v1178_v50 = vpop.permute.xlu2 %1177 }
 0x18c   : > { %v1084_v39 = vpop.permute.xlu1 %1083  ;;  %v1302_v42 = vsel %vm1299_vm7, %v1297_v30, %v1134_v40  ;;  %v2103_v30 = vmov 32.0  }
 0x18d   : > { %v1286_v41 = vsel %vm1284_vm4, %v1281_v3, %v1084_v39  ;;  %1920 = vrcp.f32 %v2103_v30 }
 0x18e   : > { %v1291_v43 = vsel %vm1289_vm5, %v1286_v41, %v1100_v5 }
 0x193   : > { %v1088_v47 = vpop.permute.xlu0 %1087  ;;  %v1164_v56 = vpop.permute.xlu2 %1163 }
 0x194   : > { %v1116_v45 = vpop.permute.xlu1 %1115  ;;  %v1288_v48 = vsel %vm1284_vm4, %v1283_v31, %v1088_v47 }
 0x195   : > { %v1296_v46 = vsel %vm1294_vm6, %v1291_v43, %v1116_v45  ;;  %v1293_v49 = vsel %vm1289_vm5, %v1288_v48, %v1104_v44  ;;  %v1921_v44 = vpop.eup %1920 }
 0x196   : > { %vm1357_vm15 = vweird.f32 %v1921_v44 }
 0x19b   : > { %v1120_v53 = vpop.permute.xlu0 %1119  ;;  %v1166_v0 = vpop.permute.xlu2 %1165 }
 0x19c   : > { %v1132_v51 = vpop.permute.xlu1 %1131  ;;  %v1298_v54 = vsel %vm1294_vm6, %v1293_v49, %v1120_v53  ;;  %v1353_v53 = vmul.f32 32.0, %v1921_v44 }
 0x19d   : > { %v1301_v52 = vsel %vm1299_vm7, %v1296_v46, %v1132_v51 }
 0x1a3   : > { %v1146_v58 = vpop.permute.xlu0 %1145  ;;  %v1152_v3 = vpop.permute.xlu2 %1151 }
 0x1a4   : > { %v1136_v55 = vpop.permute.xlu1 %1135  ;;  %v1304_v59 = vsel %vm325_vm0, %v1300_v37, %v1146_v58 }
 0x1a5   : > { %v1303_v57 = vsel %vm1299_vm7, %v1298_v54, %v1136_v55 }
 0x1a6   : > { %v1307_v33 = vsel %vm325_vm0, %v1303_v57, %v1152_v3 }
 0x1ab   : > { %v1194_v62 = vpop.permute.xlu0 %1193  ;;  %v1200_v7 = vpop.permute.xlu2 %1199 }
 0x1ac   : > { %v1162_v60 = vpop.permute.xlu1 %1161 }
 0x1ad   : > { %v1309_v61 = vsel %vm1308_vm8, %v1304_v59, %v1162_v60  ;;  %v1354_v60 = vsub.f32 1.0, %v1353_v53 }
 0x1ae   : > { %v1314_v63 = vsel %vm1313_vm9, %v1309_v61, %v1178_v50 }
 0x1af   : > { %v1319_v31 = vsel %vm1318_vm10, %v1314_v63, %v1194_v62 }
 0x1b3   : > { %v1180_v2 = vpop.permute.xlu0 %1179  ;;  %v1226_v11 = vpop.permute.xlu2 %1225 }
 0x1b4   : > { %v1148_v1 = vpop.permute.xlu1 %1147 }
 0x1b5   : > { %v1305_v20 = vsel %vm325_vm0, %v1301_v52, %v1148_v1 }
 0x1b6   : > { %v1310_v23 = vsel %vm1308_vm8, %v1305_v20, %v1164_v56 }
 0x1b7   : > { %v1315_v26 = vsel %vm1313_vm9, %v1310_v23, %v1180_v2 }
 0x1bb   : > { %v1182_v6 = vpop.permute.xlu0 %1181  ;;  %v1212_v15 = vpop.permute.xlu2 %1211 }
 0x1bc   : > { %v1196_v5 = vpop.permute.xlu1 %1195 }
 0x1bd   : > { %v1320_v28 = vsel %vm1318_vm10, %v1315_v26, %v1196_v5 }
 0x1be   : > { %v1325_v34 = vsel %vm1323_vm11, %v1320_v28, %v1212_v15 }
 0x1c3   : > { %v1168_v4 = vpop.permute.xlu0 %1167  ;;  %v1260_v18 = vpop.permute.xlu2 %1259 }
 0x1c4   : > { %v1150_v9 = vpop.permute.xlu1 %1149  ;;  %v1312_v12 = vsel %vm1308_vm8, %v1307_v33, %v1168_v4 }
 0x1c5   : > { %v1306_v21 = vsel %vm325_vm0, %v1302_v42, %v1150_v9 }
 0x1c6   : > { %v1311_v25 = vsel %vm1308_vm8, %v1306_v21, %v1166_v0  ;;  %v1355_v0 = vmul.f32 %v1921_v44, %v1354_v60 }
 0x1c7   : > { %v1316_v29 = vsel %vm1313_vm9, %v1311_v25, %v1182_v6 }
 0x1c8   : > { %v1356_v3 = vadd.f32 %v1921_v44, %v1355_v0 }
 0x1cb   : > { %v1242_v13 = vpop.permute.xlu0 %1241  ;;  %v1214_v22 = vpop.permute.xlu2 %1213 }
 0x1cc   : > { %v1198_v10 = vpop.permute.xlu1 %1197 }
 0x1cd   : > { %v1321_v32 = vsel %vm1318_vm10, %v1316_v29, %v1198_v10 }
 0x1ce   : > { %v1326_v38 = vsel %vm1323_vm11, %v1321_v32, %v1214_v22 }
 0x1d3   : > { %v1228_v16 = vpop.permute.xlu0 %1227  ;;  %v1232_v40 = vpop.permute.xlu2 %1231 }
 0x1d4   : > { %v1184_v14 = vpop.permute.xlu1 %1183  ;;  %v1330_v36 = vsel %vm1328_vm12, %v1325_v34, %v1228_v16  ;;  %v1378_v34 = vld [vmem:[%s266_s13] sm:$0x1] }
 0x1d5   : > { %v1317_v39 = vsel %vm1313_vm9, %v1312_v12, %v1184_v14 }
 0x1d6   : > { %v1322_v47 = vsel %vm1318_vm10, %v1317_v39, %v1200_v7  ;;  %v1358_v7 = vsel %vm1357_vm15, %v1921_v44, %v1356_v3 }
 0x1db   : > { %v1230_v8 = vpop.permute.xlu0 %1229  ;;  %v1264_v57 = vpop.permute.xlu2 %1263 }
 0x1dc   : > { %v1210_v17 = vpop.permute.xlu1 %1209  ;;  %v1331_v42 = vsel %vm1328_vm12, %v1326_v38, %v1230_v8 }
 0x1dd   : > { %v1324_v35 = vsel %vm1323_vm11, %v1319_v31, %v1210_v17 }
 0x1de   : > { %v1329_v43 = vsel %vm1328_vm12, %v1324_v35, %v1226_v11 }
 0x1df   : > { %v1334_v49 = vsel %vm1333_vm13, %v1329_v43, %v1242_v13 }
 0x1e3   : > { %v1216_v27 = vpop.permute.xlu0 %1215 }
 0x1e4   : > { %v1258_v19 = vpop.permute.xlu1 %1257  ;;  %v1327_v50 = vsel %vm1323_vm11, %v1322_v47, %v1216_v27 }
 0x1e5   : > { %v2477_v51 = vsel %vm1338_vm14, %v1334_v49, %v1258_v19  ;;  %v1332_v56 = vsel %vm1328_vm12, %v1327_v50, %v1232_v40 }
 0x1eb   : > { %v1262_v46 = vpop.permute.xlu0 %1261 }
 0x1ec   : > { %v1244_v24 = vpop.permute.xlu1 %1243 }
 0x1ed   : > { %v1335_v41 = vsel %vm1333_vm13, %v1330_v36, %v1244_v24 }
 0x1ee   : > { %v2472_v48 = vsel %vm1338_vm14, %v1335_v41, %v1260_v18 }
 0x1ef   : > { %v1343_v54 = vadd.f32 %v2472_v48, %v2477_v51 }
 0x1f4   : > { %v1246_v37 = vpop.permute.xlu1 %1245 }
 0x1f5   : > { %v1336_v45 = vsel %vm1333_vm13, %v1331_v42, %v1246_v37  ;;  %v1391_v37 = vld [vmem:[%s308_s30] sm:$0x1] }
 0x1f6   : > { %v2480_v52 = vsel %vm1338_vm14, %v1336_v45, %v1262_v46 }
 0x1f7   : > { %v1344_v58 = vadd.f32 %v1343_v54, %v2480_v52 }
 0x1fc   : > { %v1248_v55 = vpop.permute.xlu1 %1247 }
 0x1fd   : > { %v1337_v59 = vsel %vm1333_vm13, %v1332_v56, %v1248_v55 }
 0x1fe   : > { %v1342_v61 = vsel %vm1338_vm14, %v1337_v59, %v1264_v57 }
 0x1ff   : > { %v1345_v62 = vadd.f32 %v1344_v58, %v1342_v61 }
 0x201   : > { %v1346_v63 = vrot.slane %v1345_v62, 4 }
 0x203   : > { %v1347_v1 = vadd.f32 %v1346_v63, %v1345_v62 }
 0x205   : > { %v1348_v2 = vrot.slane %v1347_v1, 2 }
 0x207   : > { %v1349_v5 = vadd.f32 %v1348_v2, %v1347_v1 }
 0x209   : > { %v1350_v6 = vrot.slane %v1349_v5, 1 }
 0x20b   : > { %v1351_v9 = vadd.f32 %v1350_v6, %v1349_v5 }
 0x20d   : > { %v1359_v4 = vmul.f32 %v1358_v7, %v1351_v9 }
 0x20f   : > { %v1360_v10 = vsub.f32 %v2477_v51, %v1359_v4  ;;  %v1361_v11 = vsub.f32 %v2472_v48, %v1359_v4  ;;  %v1362_v13 = vsub.f32 %v2480_v52, %v1359_v4  ;;  %v1363_v14 = vsub.f32 %v1342_v61, %v1359_v4 }
 0x211   : > { %v1364_v15 = vmul.f32 %v1360_v10, %v1360_v10  ;;  %v1365_v16 = vmul.f32 %v1361_v11, %v1361_v11  ;;  %v1366_v17 = vmul.f32 %v1362_v13, %v1362_v13  ;;  %v1367_v19 = vmul.f32 %v1363_v14, %v1363_v14 }
 0x213   : > { %v1368_v18 = vadd.f32 %v1365_v16, %v1364_v15 }
 0x215   : > { %v1369_v8 = vadd.f32 %v1368_v18, %v1366_v17 }
 0x217   : > { %v1370_v20 = vadd.f32 %v1369_v8, %v1367_v19 }
 0x219   : > { %v1371_v21 = vrot.slane %v1370_v20, 4 }
 0x21b   : > { %v1372_v22 = vadd.f32 %v1371_v21, %v1370_v20 }
 0x21d   : > { %v1373_v23 = vrot.slane %v1372_v22, 2 }
 0x21f   : > { %v1374_v24 = vadd.f32 %v1373_v23, %v1372_v22 }
 0x221   : > { %v1375_v25 = vrot.slane %v1374_v24, 1 }
 0x223   : > { %v1376_v26 = vadd.f32 %v1375_v25, %v1374_v24 }
 0x225   : > { %v1377_v27 = vmul.f32 %v1376_v26, %v1358_v7 }
 0x227   : > { %v1379_v28 = vadd.f32 1e-05, %v1377_v27 }
 0x229   : > { %1922 = vrsqrt.f32 %v1379_v28  ;;  %vm1386_vm1 = vweird.f32 %v1379_v28 }
 0x22f   : > { %v1923_v29 = vpop.eup %1922 }
 0x230   : > { %v1381_v30 = vmul.f32 %v1923_v29, %v1379_v28  ;;  %vm1387_vm0 = vweird.f32 %v1923_v29 }
 0x231   : > { %vm1388_vm2 = vmor %vm1386_vm1, %vm1387_vm0 }
 0x232   : > { %v1382_v31 = vmul.f32 %v1923_v29, %v1381_v30 }
 0x234   : > { %v1383_v32 = vmul.f32 0.5, %v1382_v31 }
 0x236   : > { %v1384_v33 = vsub.f32 1.5, %v1383_v32 }
 0x238   : > { %v1385_v35 = vmul.f32 %v1923_v29, %v1384_v33 }
 0x23a   : > { %v1389_v12 = vsel %vm1388_vm2, %v1923_v29, %v1385_v35 }
 0x23b   : > { %v1390_v36 = vmul.f32 %v1389_v12, %v1378_v34 }
 0x23d   : > { %v1392_v38 = vmul.f32 %v1390_v36, %v1359_v4  ;;  %v1395_v39 = vperm.slane %v1390_v36, 0 }
 0x23f   : > { %v1393_v40 = vsub.f32 %v1391_v37, %v1392_v38  ;;  %v1397_v41 = vmul.f32 %v1395_v39, %v2477_v51  ;;  %v1398_v42 = vmul.f32 %v1395_v39, %v2472_v48  ;;  %v1399_v43 = vmul.f32 %v1395_v39, %v2480_v52 }
 0x240   : > { %v1400_v44 = vmul.f32 %v1395_v39, %v1342_v61 }
 0x241   : > { %v1402_v45 = vperm.slane %v1393_v40, 0 }
 0x243   : > { %v1404_v46 = vadd.f32 %v1402_v45, %v1397_v41  ;;  %v1405_v47 = vadd.f32 %v1402_v45, %v1398_v42  ;;  %v1406_v49 = vadd.f32 %v1402_v45, %v1399_v43  ;;  %v1407_v50 = vadd.f32 %v1402_v45, %v1400_v44 }
 0x245   : > { %v1408_v53 = vmul.f32 0.2, %v1404_v46  ;;  %v1409_v51 = vmul.f32 0.2, %v1405_v47  ;;  %v1410_v54 = vmul.f32 0.2, %v1406_v49 }
 0x246   : > { %v1411_v55 = vmul.f32 0.2, %v1407_v50 }
 0x247   : > { %v1412_v48 = vmax.f32 %v1404_v46, %v1408_v53  ;;  %v1413_v52 = vmax.f32 %v1405_v47, %v1409_v51  ;;  %v1414_v56 = vmax.f32 %v1406_v49, %v1410_v54 }
 0x248   : > { %v1415_v57 = vmax.f32 %v1407_v50, %v1411_v55 }
 0x249   : > { %1416 = vst [vmem:[%s303_s12] sm:$0xff] %v1412_v48 }
 0x24a   : > { %1417 = vst [vmem:[%s303_s12 + $0x8] sm:$0xff] %v1413_v52 }
 0x24b   : > { %1418 = vst [vmem:[%s303_s12 + $0x10] sm:$0xff] %v1414_v56 }
 0x24c   : > { %1419 = vst [vmem:[%s303_s12 + $0x18] sm:$0xff] %v1415_v57 }
 0x24d   : > { %2041 = shalt.err (!%p2038_p7)
}
 0x24e   : > { %s2104_s28 = smov 128   ;;  %s2105_s14 = smov 256  }
 0x24f   : > { %1850 = dma.vmem_to_hbm [thread:$0]  (%p2177_p11), %s1433_s10, 512, %s1435_s19, %s1421_s1, %s2104_s28, %s2105_s14, %s2088_s25  }
 0x250 PF: > { %s1449_s23 = sand.u32 1, %s2072_s15   ;;  %p1863_p8 = pnand %p1558_p9, %p2181_p12 }
 0x251   : > { %s1450_s30 = scalar_lea.sflag [#allocation4], %s1449_s23 }
 0x252   : > { %p1864_p10 = pneg %p1863_p8 }
 0x254   : > { %2067 = dma.done.wait (%p1864_p10), %s1450_s30, 512  }
 0x255   : > { %2069 = vsyncadd (%p1864_p10), %s1450_s30, 4294966784  ;;  %s2554_s8 = sld [smem:[#allocation12_spill]]  ;;  %p20_p1 = scmp.ge.s32.totalorder %s2156_s21, 4  }
 0x256   : > { %s2555_s15 = smov %s2076_s16  ;;  %s2556_s16 = smov %s2080_s17 }
 0x257   : > { %s2558_s18 = smov %s2156_s21  ;;  %22 = sbr.rel (!%p20_p1) target bundleno = 10 (0xa), region = 138 }
 0x25b   : > { %s2557_s17 = smov %s2554_s8 }
 0x25c   :  { %1456 = vsyncpa [#allocation3], 1 }
 0x25d   :  { %1458 = vsyncpa [#allocation3 + $0x1], 1 }
 0x25e   :  { %1459 = vsyncpa [#allocation6], 1 }
 0x25f   :  { %1461 = vsyncpa [#allocation6 + $0x1], 1 }
 0x260   :  { %1462 = vsyncpa [#allocation4], 1 }
 0x261   :  { %1464 = vsyncpa [#allocation4 + $0x1], 1 }

</bundles_post_ra>
